<compile_context>
chip_gen: v7x
topology: tpu7x:2x2x1
jax: 0.10.0
libtpu: 0.0.40
codegen_flags: <defaults>
</compile_context>

<pallas_src>
import functools

import jax
import jax.numpy as jnp
from jax import lax
from jax.experimental import pallas as pl
from jax.experimental.pallas import tpu as pltpu


def _lstm_fc_kernel(x_ref, wih_ref, whh_ref, b_ref, wfc_ref, bfc_ref,
                    out_ref, hn_ref, *, T):
    """Whole LSTM recurrence + final Linear in one kernel invocation.

    x_ref   : (T*B, I)  time-major flattened input (row = t*B + b)
    wih_ref : (I, 4H)   fused input->gate weights, gate order (i, f, o, g)
    whh_ref : (H, 4H)   fused hidden->gate weights, gate order (i, f, o, g)
    b_ref   : (1, 4H)   combined bias (b_ih + b_hh), gate order (i, f, o, g)
    wfc_ref : (O, H)    fc weight (PyTorch layout)
    bfc_ref : (1, O)    fc bias
    out_ref : (B, O)    fc(out[:, -1, :])
    hn_ref  : (B, H)    final hidden state (layer 0)
    """
    TB, _I = x_ref.shape
    B = TB // T
    H, H4 = whh_ref.shape
    O = wfc_ref.shape[0]

    # Hoist loop-invariant loads (no per-step VMEM loads / broadcasts).
    wih = wih_ref[...]                                    # (I, 4H) f32
    whh_bf = whh_ref[...].astype(jnp.bfloat16)            # (H, 4H) bf16 (serial path)
    b = b_ref[...]                                        # (1, 4H)

    # Input projection hoisted off the recurrence: one lane-dense matmul for
    # all T timesteps (off the critical path -> keep it f32).
    gx = jnp.dot(x_ref[...], wih,
                 preferred_element_type=jnp.float32) + b  # (T*B, 4H)
    gx = gx.reshape(T, B, H4)                             # time-major: gx[t] is
                                                          # a contiguous sublane slice

    h = jnp.zeros((B, H), jnp.float32)
    c = jnp.zeros((B, H), jnp.float32)

    # Fully unrolled recurrence (T static & small) — only h @ Whh is serial.
    for t in range(T):
        pre = gx[t] + jnp.dot(h.astype(jnp.bfloat16), whh_bf,
                              preferred_element_type=jnp.float32)   # (B, 4H)
        # Full-vreg EUP pushes; slice gates AFTER the activations so no lane
        # select/rotate sits in front of the EUP on the serial chain.
        s = jax.nn.sigmoid(pre)                           # (B, 4H)
        tg = jnp.tanh(pre)                                # (B, 4H)
        i_g = s[:, 0:H]
        f_g = s[:, H:2 * H]
        o_g = s[:, 2 * H:3 * H]
        g_g = tg[:, 3 * H:4 * H]
        c = f_g * c + i_g * g_g
        h = o_g * jnp.tanh(c)

    hn_ref[...] = h

    if O == 1:
        # O==1: VPU multiply + lane reduction; skip the (mostly padded) MXU push.
        out_ref[...] = (jnp.sum(h * wfc_ref[...], axis=1, keepdims=True)
                        + bfc_ref[...])
    else:
        out_ref[...] = (lax.dot_general(
            h, wfc_ref[...], (((1,), (1,)), ((), ())),
            preferred_element_type=jnp.float32) + bfc_ref[...])


@jax.jit
def univariate_lstm_forward(x, packed):
    """x: (B, T, I) float32. Returns (out (B, O), hn (1, B, H)) — PyTorch semantics."""
    wih_f, whh_f, b_f, wfc, bfc = packed
    B, T, I = x.shape
    H = whh_f.shape[0]
    O = wfc.shape[0]

    # Time-major layout so the kernel's per-step gx read is a contiguous
    # sublane slice (one tiny wrapper-side transpose, off the critical path).
    xt = jnp.transpose(x, (1, 0, 2)).reshape(T * B, I)

    out, hn = pl.pallas_call(
        functools.partial(_lstm_fc_kernel, T=T),
        out_shape=(
            jax.ShapeDtypeStruct((B, O), jnp.float32),    # fc(out[:, -1, :])
            jax.ShapeDtypeStruct((B, H), jnp.float32),    # hn (layer dim added below)
        ),
        in_specs=[pl.BlockSpec(memory_space=pltpu.MemorySpace.VMEM)] * 6,
        out_specs=(
            pl.BlockSpec(memory_space=pltpu.MemorySpace.VMEM),
            pl.BlockSpec(memory_space=pltpu.MemorySpace.VMEM),
        ),
    )(xt, wih_f, whh_f, b_f, wfc, bfc)

    return out, hn[None, :, :]                            # hn: (1, B, H)


def init_raw_params(key, input_size, hidden_size, output_size):
    """PyTorch-layout parameters, U(-1/sqrt(H), 1/sqrt(H)) init."""
    H, I, O = hidden_size, input_size, output_size
    k = 1.0 / jnp.sqrt(jnp.float32(H))
    keys = jax.random.split(key, 6)
    w_ih = jax.random.uniform(keys[0], (4 * H, I), jnp.float32, -k, k)
    w_hh = jax.random.uniform(keys[1], (4 * H, H), jnp.float32, -k, k)
    b_ih = jax.random.uniform(keys[2], (4 * H,), jnp.float32, -k, k)
    b_hh = jax.random.uniform(keys[3], (4 * H,), jnp.float32, -k, k)
    w_fc = jax.random.uniform(keys[4], (O, H), jnp.float32, -k, k)
    b_fc = jax.random.uniform(keys[5], (O,), jnp.float32, -k, k)
    return (w_ih, w_hh, b_ih, b_hh, w_fc, b_fc)


def pack_params(raw):
    """Repack PyTorch-layout weights into the kernel's fused layout.

    PyTorch gate order along the 4H axis is (i, f, g, o); the kernel uses
    (i, f, o, g) so sigmoid/tanh gate extraction is a contiguous slab slice.
    """
    w_ih, w_hh, b_ih, b_hh, w_fc, b_fc = raw
    H = w_hh.shape[1]
    I = w_ih.shape[1]
    O = w_fc.shape[0]
    perm = jnp.array([0, 1, 3, 2])                        # (i, f, g, o) -> (i, f, o, g)

    wih_f = jnp.transpose(w_ih.reshape(4, H, I)[perm], (2, 0, 1)).reshape(I, 4 * H)
    whh_f = jnp.transpose(w_hh.reshape(4, H, H)[perm], (2, 0, 1)).reshape(H, 4 * H)
    b_f = (b_ih + b_hh).reshape(4, H)[perm].reshape(1, 4 * H)
    bfc = b_fc.reshape(1, O)
    return (wih_f, whh_f, b_f, w_fc, bfc)


def _reference_forward(x, raw):
    """Pure-JAX f32 reference of nn.LSTM(batch_first=True) + Linear on last step."""
    w_ih, w_hh, b_ih, b_hh, w_fc, b_fc = raw
    B, T, I = x.shape
    H = w_hh.shape[1]

    def step(carry, x_t):
        h, c = carry
        gates = x_t @ w_ih.T + b_ih + h @ w_hh.T + b_hh   # (B, 4H), (i, f, g, o)
        i_g = jax.nn.sigmoid(gates[:, 0:H])
        f_g = jax.nn.sigmoid(gates[:, H:2 * H])
        g_g = jnp.tanh(gates[:, 2 * H:3 * H])
        o_g = jax.nn.sigmoid(gates[:, 3 * H:4 * H])
        c_new = f_g * c + i_g * g_g
        h_new = o_g * jnp.tanh(c_new)
        return (h_new, c_new), None

    (h_last, _), _ = lax.scan(
        step,
        (jnp.zeros((B, H), jnp.float32), jnp.zeros((B, H), jnp.float32)),
        jnp.transpose(x, (1, 0, 2)))
    out = h_last @ w_fc.T + b_fc
    return out, h_last[None, :, :]


if __name__ == "__main__":
    # Small shapes consistent with the module: univariate-ish series.
    B, T, I, H, O = 2, 8, 4, 32, 1

    key = jax.random.PRNGKey(0)
    k_x, k_p = jax.random.split(key)
    x = jax.random.normal(k_x, (B, T, I), jnp.float32)
    raw = init_raw_params(k_p, I, H, O)
    packed = pack_params(raw)

    out, hn = univariate_lstm_forward(x, packed)
    jax.block_until_ready((out, hn))

    ref_out, ref_hn = _reference_forward(x, raw)
    assert out.shape == (B, O) and hn.shape == (1, B, H)
    # Tolerance relaxed (3e-5 -> 1e-2) because the recurrent matmul now runs
    # with bf16 weights/operands (review item); the reference is pure f32.
    assert jnp.allclose(out, ref_out, atol=1e-2, rtol=1e-2)
    assert jnp.allclose(hn, ref_hn, atol=1e-2, rtol=1e-2)

    print("KERNEL_OK")
</pallas_src>

<mosaic_0001>
module attributes {stable_mosaic.version = 11 : i64} {
  func.func @_lstm_fc_kernel(%arg0: memref<16x4xf32, #tpu.memory_space<vmem>>, %arg1: memref<4x128xf32, #tpu.memory_space<vmem>>, %arg2: memref<32x128xf32, #tpu.memory_space<vmem>>, %arg3: memref<1x128xf32, #tpu.memory_space<vmem>>, %arg4: memref<1x32xf32, #tpu.memory_space<vmem>>, %arg5: memref<1x1xf32, #tpu.memory_space<vmem>>, %arg6: memref<2x1xf32, #tpu.memory_space<vmem>>, %arg7: memref<2x32xf32, #tpu.memory_space<vmem>>) attributes {dimension_semantics = [], scalar_prefetch = 0 : i64, scratch_operands = 0 : i64, tpu.core_type = #tpu.core_type<tc>} {
    %c0 = arith.constant 0 : index
    %c0_0 = arith.constant 0 : index
    %0 = vector.load %arg1[%c0, %c0_0] : memref<4x128xf32, #tpu.memory_space<vmem>>, vector<4x128xf32>
    %c0_1 = arith.constant 0 : index
    %c0_2 = arith.constant 0 : index
    %1 = vector.load %arg2[%c0_1, %c0_2] : memref<32x128xf32, #tpu.memory_space<vmem>>, vector<32x128xf32>
    %2 = arith.truncf %1 : vector<32x128xf32> to vector<32x128xbf16>
    %c0_3 = arith.constant 0 : index
    %c0_4 = arith.constant 0 : index
    %3 = vector.load %arg3[%c0_3, %c0_4] : memref<1x128xf32, #tpu.memory_space<vmem>>, vector<1x128xf32>
    %c0_5 = arith.constant 0 : index
    %c0_6 = arith.constant 0 : index
    %4 = vector.load %arg0[%c0_5, %c0_6] : memref<16x4xf32, #tpu.memory_space<vmem>>, vector<16x4xf32>
    %cst = arith.constant dense<0.000000e+00> : vector<16x128xf32>
    %5 = tpu.matmul %4, %0, %cst {dimension_numbers = #tpu.dot_dimension_numbers<[1], [0], [0], [1], [0, 0, 1, 1], [], []>} : vector<16x4xf32>, vector<4x128xf32>, vector<16x128xf32> -> vector<16x128xf32>
    %6 = vector.broadcast %3 : vector<1x128xf32> to vector<16x128xf32>
    %7 = arith.addf %5, %6 : vector<16x128xf32>
    %8 = vector.shape_cast %7 : vector<16x128xf32> to vector<8x2x128xf32>
    %cst_7 = arith.constant 0.000000e+00 : f32
    %9 = vector.broadcast %cst_7 : f32 to vector<2x32xf32>
    %cst_8 = arith.constant 0.000000e+00 : f32
    %10 = vector.broadcast %cst_8 : f32 to vector<2x32xf32>
    %11 = vector.extract_strided_slice %8 {offsets = [0, 0, 0], sizes = [1, 2, 128], strides = [1, 1, 1]} : vector<8x2x128xf32> to vector<1x2x128xf32>
    %12 = vector.shape_cast %11 : vector<1x2x128xf32> to vector<2x128xf32>
    %13 = arith.truncf %9 : vector<2x32xf32> to vector<2x32xbf16>
    %cst_9 = arith.constant dense<0.000000e+00> : vector<2x128xf32>
    %14 = tpu.matmul %13, %2, %cst_9 {dimension_numbers = #tpu.dot_dimension_numbers<[1], [0], [0], [1], [0, 0, 1, 1], [], []>} : vector<2x32xbf16>, vector<32x128xbf16>, vector<2x128xf32> -> vector<2x128xf32>
    %15 = arith.addf %12, %14 : vector<2x128xf32>
    %16 = arith.negf %15 : vector<2x128xf32>
    %17 = math.exp %16 : vector<2x128xf32>
    %cst_10 = arith.constant 1.000000e+00 : f32
    %18 = vector.broadcast %cst_10 : f32 to vector<2x128xf32>
    %19 = arith.addf %18, %17 : vector<2x128xf32>
    %20 = arith.divf %18, %19 : vector<2x128xf32>
    %21 = math.tanh %15 : vector<2x128xf32>
    %22 = vector.extract_strided_slice %20 {offsets = [0, 0], sizes = [2, 32], strides = [1, 1]} : vector<2x128xf32> to vector<2x32xf32>
    %23 = vector.extract_strided_slice %20 {offsets = [0, 32], sizes = [2, 32], strides = [1, 1]} : vector<2x128xf32> to vector<2x32xf32>
    %24 = vector.extract_strided_slice %20 {offsets = [0, 64], sizes = [2, 32], strides = [1, 1]} : vector<2x128xf32> to vector<2x32xf32>
    %25 = vector.extract_strided_slice %21 {offsets = [0, 96], sizes = [2, 32], strides = [1, 1]} : vector<2x128xf32> to vector<2x32xf32>
    %26 = arith.mulf %23, %10 : vector<2x32xf32>
    %27 = arith.mulf %22, %25 : vector<2x32xf32>
    %28 = arith.addf %26, %27 : vector<2x32xf32>
    %29 = math.tanh %28 : vector<2x32xf32>
    %30 = arith.mulf %24, %29 : vector<2x32xf32>
    %31 = vector.extract_strided_slice %8 {offsets = [1, 0, 0], sizes = [1, 2, 128], strides = [1, 1, 1]} : vector<8x2x128xf32> to vector<1x2x128xf32>
    %32 = vector.shape_cast %31 : vector<1x2x128xf32> to vector<2x128xf32>
    %33 = arith.truncf %30 : vector<2x32xf32> to vector<2x32xbf16>
    %cst_11 = arith.constant dense<0.000000e+00> : vector<2x128xf32>
    %34 = tpu.matmul %33, %2, %cst_11 {dimension_numbers = #tpu.dot_dimension_numbers<[1], [0], [0], [1], [0, 0, 1, 1], [], []>} : vector<2x32xbf16>, vector<32x128xbf16>, vector<2x128xf32> -> vector<2x128xf32>
    %35 = arith.addf %32, %34 : vector<2x128xf32>
    %36 = arith.negf %35 : vector<2x128xf32>
    %37 = math.exp %36 : vector<2x128xf32>
    %cst_12 = arith.constant 1.000000e+00 : f32
    %38 = vector.broadcast %cst_12 : f32 to vector<2x128xf32>
    %39 = arith.addf %38, %37 : vector<2x128xf32>
    %40 = arith.divf %38, %39 : vector<2x128xf32>
    %41 = math.tanh %35 : vector<2x128xf32>
    %42 = vector.extract_strided_slice %40 {offsets = [0, 0], sizes = [2, 32], strides = [1, 1]} : vector<2x128xf32> to vector<2x32xf32>
    %43 = vector.extract_strided_slice %40 {offsets = [0, 32], sizes = [2, 32], strides = [1, 1]} : vector<2x128xf32> to vector<2x32xf32>
    %44 = vector.extract_strided_slice %40 {offsets = [0, 64], sizes = [2, 32], strides = [1, 1]} : vector<2x128xf32> to vector<2x32xf32>
    %45 = vector.extract_strided_slice %41 {offsets = [0, 96], sizes = [2, 32], strides = [1, 1]} : vector<2x128xf32> to vector<2x32xf32>
    %46 = arith.mulf %43, %28 : vector<2x32xf32>
    %47 = arith.mulf %42, %45 : vector<2x32xf32>
    %48 = arith.addf %46, %47 : vector<2x32xf32>
    %49 = math.tanh %48 : vector<2x32xf32>
    %50 = arith.mulf %44, %49 : vector<2x32xf32>
    %51 = vector.extract_strided_slice %8 {offsets = [2, 0, 0], sizes = [1, 2, 128], strides = [1, 1, 1]} : vector<8x2x128xf32> to vector<1x2x128xf32>
    %52 = vector.shape_cast %51 : vector<1x2x128xf32> to vector<2x128xf32>
    %53 = arith.truncf %50 : vector<2x32xf32> to vector<2x32xbf16>
    %cst_13 = arith.constant dense<0.000000e+00> : vector<2x128xf32>
    %54 = tpu.matmul %53, %2, %cst_13 {dimension_numbers = #tpu.dot_dimension_numbers<[1], [0], [0], [1], [0, 0, 1, 1], [], []>} : vector<2x32xbf16>, vector<32x128xbf16>, vector<2x128xf32> -> vector<2x128xf32>
    %55 = arith.addf %52, %54 : vector<2x128xf32>
    %56 = arith.negf %55 : vector<2x128xf32>
    %57 = math.exp %56 : vector<2x128xf32>
    %cst_14 = arith.constant 1.000000e+00 : f32
    %58 = vector.broadcast %cst_14 : f32 to vector<2x128xf32>
    %59 = arith.addf %58, %57 : vector<2x128xf32>
    %60 = arith.divf %58, %59 : vector<2x128xf32>
    %61 = math.tanh %55 : vector<2x128xf32>
    %62 = vector.extract_strided_slice %60 {offsets = [0, 0], sizes = [2, 32], strides = [1, 1]} : vector<2x128xf32> to vector<2x32xf32>
    %63 = vector.extract_strided_slice %60 {offsets = [0, 32], sizes = [2, 32], strides = [1, 1]} : vector<2x128xf32> to vector<2x32xf32>
    %64 = vector.extract_strided_slice %60 {offsets = [0, 64], sizes = [2, 32], strides = [1, 1]} : vector<2x128xf32> to vector<2x32xf32>
    %65 = vector.extract_strided_slice %61 {offsets = [0, 96], sizes = [2, 32], strides = [1, 1]} : vector<2x128xf32> to vector<2x32xf32>
    %66 = arith.mulf %63, %48 : vector<2x32xf32>
    %67 = arith.mulf %62, %65 : vector<2x32xf32>
    %68 = arith.addf %66, %67 : vector<2x32xf32>
    %69 = math.tanh %68 : vector<2x32xf32>
    %70 = arith.mulf %64, %69 : vector<2x32xf32>
    %71 = vector.extract_strided_slice %8 {offsets = [3, 0, 0], sizes = [1, 2, 128], strides = [1, 1, 1]} : vector<8x2x128xf32> to vector<1x2x128xf32>
    %72 = vector.shape_cast %71 : vector<1x2x128xf32> to vector<2x128xf32>
    %73 = arith.truncf %70 : vector<2x32xf32> to vector<2x32xbf16>
    %cst_15 = arith.constant dense<0.000000e+00> : vector<2x128xf32>
    %74 = tpu.matmul %73, %2, %cst_15 {dimension_numbers = #tpu.dot_dimension_numbers<[1], [0], [0], [1], [0, 0, 1, 1], [], []>} : vector<2x32xbf16>, vector<32x128xbf16>, vector<2x128xf32> -> vector<2x128xf32>
    %75 = arith.addf %72, %74 : vector<2x128xf32>
    %76 = arith.negf %75 : vector<2x128xf32>
    %77 = math.exp %76 : vector<2x128xf32>
    %cst_16 = arith.constant 1.000000e+00 : f32
    %78 = vector.broadcast %cst_16 : f32 to vector<2x128xf32>
    %79 = arith.addf %78, %77 : vector<2x128xf32>
    %80 = arith.divf %78, %79 : vector<2x128xf32>
    %81 = math.tanh %75 : vector<2x128xf32>
    %82 = vector.extract_strided_slice %80 {offsets = [0, 0], sizes = [2, 32], strides = [1, 1]} : vector<2x128xf32> to vector<2x32xf32>
    %83 = vector.extract_strided_slice %80 {offsets = [0, 32], sizes = [2, 32], strides = [1, 1]} : vector<2x128xf32> to vector<2x32xf32>
    %84 = vector.extract_strided_slice %80 {offsets = [0, 64], sizes = [2, 32], strides = [1, 1]} : vector<2x128xf32> to vector<2x32xf32>
    %85 = vector.extract_strided_slice %81 {offsets = [0, 96], sizes = [2, 32], strides = [1, 1]} : vector<2x128xf32> to vector<2x32xf32>
    %86 = arith.mulf %83, %68 : vector<2x32xf32>
    %87 = arith.mulf %82, %85 : vector<2x32xf32>
    %88 = arith.addf %86, %87 : vector<2x32xf32>
    %89 = math.tanh %88 : vector<2x32xf32>
    %90 = arith.mulf %84, %89 : vector<2x32xf32>
    %91 = vector.extract_strided_slice %8 {offsets = [4, 0, 0], sizes = [1, 2, 128], strides = [1, 1, 1]} : vector<8x2x128xf32> to vector<1x2x128xf32>
    %92 = vector.shape_cast %91 : vector<1x2x128xf32> to vector<2x128xf32>
    %93 = arith.truncf %90 : vector<2x32xf32> to vector<2x32xbf16>
    %cst_17 = arith.constant dense<0.000000e+00> : vector<2x128xf32>
    %94 = tpu.matmul %93, %2, %cst_17 {dimension_numbers = #tpu.dot_dimension_numbers<[1], [0], [0], [1], [0, 0, 1, 1], [], []>} : vector<2x32xbf16>, vector<32x128xbf16>, vector<2x128xf32> -> vector<2x128xf32>
    %95 = arith.addf %92, %94 : vector<2x128xf32>
    %96 = arith.negf %95 : vector<2x128xf32>
    %97 = math.exp %96 : vector<2x128xf32>
    %cst_18 = arith.constant 1.000000e+00 : f32
    %98 = vector.broadcast %cst_18 : f32 to vector<2x128xf32>
    %99 = arith.addf %98, %97 : vector<2x128xf32>
    %100 = arith.divf %98, %99 : vector<2x128xf32>
    %101 = math.tanh %95 : vector<2x128xf32>
    %102 = vector.extract_strided_slice %100 {offsets = [0, 0], sizes = [2, 32], strides = [1, 1]} : vector<2x128xf32> to vector<2x32xf32>
    %103 = vector.extract_strided_slice %100 {offsets = [0, 32], sizes = [2, 32], strides = [1, 1]} : vector<2x128xf32> to vector<2x32xf32>
    %104 = vector.extract_strided_slice %100 {offsets = [0, 64], sizes = [2, 32], strides = [1, 1]} : vector<2x128xf32> to vector<2x32xf32>
    %105 = vector.extract_strided_slice %101 {offsets = [0, 96], sizes = [2, 32], strides = [1, 1]} : vector<2x128xf32> to vector<2x32xf32>
    %106 = arith.mulf %103, %88 : vector<2x32xf32>
    %107 = arith.mulf %102, %105 : vector<2x32xf32>
    %108 = arith.addf %106, %107 : vector<2x32xf32>
    %109 = math.tanh %108 : vector<2x32xf32>
    %110 = arith.mulf %104, %109 : vector<2x32xf32>
    %111 = vector.extract_strided_slice %8 {offsets = [5, 0, 0], sizes = [1, 2, 128], strides = [1, 1, 1]} : vector<8x2x128xf32> to vector<1x2x128xf32>
    %112 = vector.shape_cast %111 : vector<1x2x128xf32> to vector<2x128xf32>
    %113 = arith.truncf %110 : vector<2x32xf32> to vector<2x32xbf16>
    %cst_19 = arith.constant dense<0.000000e+00> : vector<2x128xf32>
    %114 = tpu.matmul %113, %2, %cst_19 {dimension_numbers = #tpu.dot_dimension_numbers<[1], [0], [0], [1], [0, 0, 1, 1], [], []>} : vector<2x32xbf16>, vector<32x128xbf16>, vector<2x128xf32> -> vector<2x128xf32>
    %115 = arith.addf %112, %114 : vector<2x128xf32>
    %116 = arith.negf %115 : vector<2x128xf32>
    %117 = math.exp %116 : vector<2x128xf32>
    %cst_20 = arith.constant 1.000000e+00 : f32
    %118 = vector.broadcast %cst_20 : f32 to vector<2x128xf32>
    %119 = arith.addf %118, %117 : vector<2x128xf32>
    %120 = arith.divf %118, %119 : vector<2x128xf32>
    %121 = math.tanh %115 : vector<2x128xf32>
    %122 = vector.extract_strided_slice %120 {offsets = [0, 0], sizes = [2, 32], strides = [1, 1]} : vector<2x128xf32> to vector<2x32xf32>
    %123 = vector.extract_strided_slice %120 {offsets = [0, 32], sizes = [2, 32], strides = [1, 1]} : vector<2x128xf32> to vector<2x32xf32>
    %124 = vector.extract_strided_slice %120 {offsets = [0, 64], sizes = [2, 32], strides = [1, 1]} : vector<2x128xf32> to vector<2x32xf32>
    %125 = vector.extract_strided_slice %121 {offsets = [0, 96], sizes = [2, 32], strides = [1, 1]} : vector<2x128xf32> to vector<2x32xf32>
    %126 = arith.mulf %123, %108 : vector<2x32xf32>
    %127 = arith.mulf %122, %125 : vector<2x32xf32>
    %128 = arith.addf %126, %127 : vector<2x32xf32>
    %129 = math.tanh %128 : vector<2x32xf32>
    %130 = arith.mulf %124, %129 : vector<2x32xf32>
    %131 = vector.extract_strided_slice %8 {offsets = [6, 0, 0], sizes = [1, 2, 128], strides = [1, 1, 1]} : vector<8x2x128xf32> to vector<1x2x128xf32>
    %132 = vector.shape_cast %131 : vector<1x2x128xf32> to vector<2x128xf32>
    %133 = arith.truncf %130 : vector<2x32xf32> to vector<2x32xbf16>
    %cst_21 = arith.constant dense<0.000000e+00> : vector<2x128xf32>
    %134 = tpu.matmul %133, %2, %cst_21 {dimension_numbers = #tpu.dot_dimension_numbers<[1], [0], [0], [1], [0, 0, 1, 1], [], []>} : vector<2x32xbf16>, vector<32x128xbf16>, vector<2x128xf32> -> vector<2x128xf32>
    %135 = arith.addf %132, %134 : vector<2x128xf32>
    %136 = arith.negf %135 : vector<2x128xf32>
    %137 = math.exp %136 : vector<2x128xf32>
    %cst_22 = arith.constant 1.000000e+00 : f32
    %138 = vector.broadcast %cst_22 : f32 to vector<2x128xf32>
    %139 = arith.addf %138, %137 : vector<2x128xf32>
    %140 = arith.divf %138, %139 : vector<2x128xf32>
    %141 = math.tanh %135 : vector<2x128xf32>
    %142 = vector.extract_strided_slice %140 {offsets = [0, 0], sizes = [2, 32], strides = [1, 1]} : vector<2x128xf32> to vector<2x32xf32>
    %143 = vector.extract_strided_slice %140 {offsets = [0, 32], sizes = [2, 32], strides = [1, 1]} : vector<2x128xf32> to vector<2x32xf32>
    %144 = vector.extract_strided_slice %140 {offsets = [0, 64], sizes = [2, 32], strides = [1, 1]} : vector<2x128xf32> to vector<2x32xf32>
    %145 = vector.extract_strided_slice %141 {offsets = [0, 96], sizes = [2, 32], strides = [1, 1]} : vector<2x128xf32> to vector<2x32xf32>
    %146 = arith.mulf %143, %128 : vector<2x32xf32>
    %147 = arith.mulf %142, %145 : vector<2x32xf32>
    %148 = arith.addf %146, %147 : vector<2x32xf32>
    %149 = math.tanh %148 : vector<2x32xf32>
    %150 = arith.mulf %144, %149 : vector<2x32xf32>
    %151 = vector.extract_strided_slice %8 {offsets = [7, 0, 0], sizes = [1, 2, 128], strides = [1, 1, 1]} : vector<8x2x128xf32> to vector<1x2x128xf32>
    %152 = vector.shape_cast %151 : vector<1x2x128xf32> to vector<2x128xf32>
    %153 = arith.truncf %150 : vector<2x32xf32> to vector<2x32xbf16>
    %cst_23 = arith.constant dense<0.000000e+00> : vector<2x128xf32>
    %154 = tpu.matmul %153, %2, %cst_23 {dimension_numbers = #tpu.dot_dimension_numbers<[1], [0], [0], [1], [0, 0, 1, 1], [], []>} : vector<2x32xbf16>, vector<32x128xbf16>, vector<2x128xf32> -> vector<2x128xf32>
    %155 = arith.addf %152, %154 : vector<2x128xf32>
    %156 = arith.negf %155 : vector<2x128xf32>
    %157 = math.exp %156 : vector<2x128xf32>
    %cst_24 = arith.constant 1.000000e+00 : f32
    %158 = vector.broadcast %cst_24 : f32 to vector<2x128xf32>
    %159 = arith.addf %158, %157 : vector<2x128xf32>
    %160 = arith.divf %158, %159 : vector<2x128xf32>
    %161 = math.tanh %155 : vector<2x128xf32>
    %162 = vector.extract_strided_slice %160 {offsets = [0, 0], sizes = [2, 32], strides = [1, 1]} : vector<2x128xf32> to vector<2x32xf32>
    %163 = vector.extract_strided_slice %160 {offsets = [0, 32], sizes = [2, 32], strides = [1, 1]} : vector<2x128xf32> to vector<2x32xf32>
    %164 = vector.extract_strided_slice %160 {offsets = [0, 64], sizes = [2, 32], strides = [1, 1]} : vector<2x128xf32> to vector<2x32xf32>
    %165 = vector.extract_strided_slice %161 {offsets = [0, 96], sizes = [2, 32], strides = [1, 1]} : vector<2x128xf32> to vector<2x32xf32>
    %166 = arith.mulf %163, %148 : vector<2x32xf32>
    %167 = arith.mulf %162, %165 : vector<2x32xf32>
    %168 = arith.addf %166, %167 : vector<2x32xf32>
    %169 = math.tanh %168 : vector<2x32xf32>
    %170 = arith.mulf %164, %169 : vector<2x32xf32>
    %c0_25 = arith.constant 0 : index
    %c0_26 = arith.constant 0 : index
    %171 = vector.load %arg7[%c0_25, %c0_26] : memref<2x32xf32, #tpu.memory_space<vmem>>, vector<2x32xf32>
    tpu.vector_store %arg7[%c0_25, %c0_26], %170 {strides = array<i32>} : memref<2x32xf32, #tpu.memory_space<vmem>>, vector<2x32xf32>,
    %c0_27 = arith.constant 0 : index
    %c0_28 = arith.constant 0 : index
    %172 = vector.load %arg4[%c0_27, %c0_28] : memref<1x32xf32, #tpu.memory_space<vmem>>, vector<1x32xf32>
    %173 = vector.broadcast %172 : vector<1x32xf32> to vector<2x32xf32>
    %174 = arith.mulf %170, %173 : vector<2x32xf32>
    %cst_29 = arith.constant dense<0.000000e+00> : vector<2xf32>
    %175 = vector.multi_reduction <add>, %174, %cst_29 [1] : vector<2x32xf32> to vector<2xf32>
    %176 = vector.shape_cast %175 : vector<2xf32> to vector<2x1xf32>
    %c0_30 = arith.constant 0 : index
    %c0_31 = arith.constant 0 : index
    %177 = vector.load %arg5[%c0_30, %c0_31] : memref<1x1xf32, #tpu.memory_space<vmem>>, vector<1x1xf32>
    %178 = vector.broadcast %177 : vector<1x1xf32> to vector<2x1xf32>
    %179 = arith.addf %176, %178 : vector<2x1xf32>
    %c0_32 = arith.constant 0 : index
    %c0_33 = arith.constant 0 : index
    %180 = vector.load %arg6[%c0_32, %c0_33] : memref<2x1xf32, #tpu.memory_space<vmem>>, vector<2x1xf32>
    tpu.vector_store %arg6[%c0_32, %c0_33], %179 {strides = array<i32>} : memref<2x1xf32, #tpu.memory_space<vmem>>, vector<2x1xf32>,
    return
  }
}

</mosaic_0001>

<bundles_post_ra>
// kernel: univariate_lstm_forward.1
= control target key start
LH: loop header
LB: loop body
LE: loop exit
PB: predicated region body
PF: predicated region fallthrough
CT: control target
= control target key end

     0   :  { %s1236_s0 = inlined_call_operand.vmem [shape: f32[16,4], index: 0, kind: input, shape index: {}]   ;;  %s1237_s1 = inlined_call_operand.vmem [shape: f32[4,128], index: 1, kind: input, shape index: {}]   ;;  %s1238_s2 = inlined_call_operand.vmem [shape: f32[32,128], index: 2, kind: input, shape index: {}]   ;;  %s1239_s3 = inlined_call_operand.vmem [shape: f32[1,128], index: 3, kind: input, shape index: {}]   ;;  %s1240_s4 = inlined_call_operand.vmem [shape: f32[1,32], index: 4, kind: input, shape index: {}]   ;;  %s1241_s5 = inlined_call_operand.<no memory space> [shape: f32[1,1], index: 5, kind: input, shape index: {}]   ;;  %s1242_s6 = inlined_call_operand.vmem [shape: f32[2,1], index: 6, kind: output, shape index: {0}]   ;;  %s1243_s7 = inlined_call_operand.hbm [shape: f32[2,32], index: 7, kind: output, shape index: {1}]  }
   0x1   :  { %v13_v0 = vstv %s1241_s5 }
   0x2   :  { %14 = vst [vmem:[#allocation2] sm:$0x1] %v13_v0 }
   0x3   :  { %v29_v1 = vld [vmem:[%s1237_s1] sm:$0xf]  ;;  %vm52_vm0 = vcmask 1043456   ;;  %vm45_vm1 = vcmask 31744   ;;  %v1032_v3 = vmov 0.0   ;;  %v31_v5 = vld [vmem:[%s1238_s2 + $0x8] sm:$0xff] }
   0x4   :  { %v37_v2 = vld [vmem:[%s1236_s0] sm:$0xff]  ;;  %868 = vmatprep.subr.msk.mxu0 %vm52_vm0, %v29_v1  ;;  %873 = vmatprep.subr.bf16.mxu1 %v1032_v3  ;;  %v38_v6 = vld [vmem:[%s1236_s0 + $0x8] sm:$0xff]  ;;  %v32_v8 = vld [vmem:[%s1238_s2 + $0x10] sm:$0xff] }
   0x5   :  { %v30_v4 = vld [vmem:[%s1238_s2] sm:$0xff]  ;;  %869 = vmatpush3.msk.msra.mxu0 %vm52_vm0, %v29_v1  ;;  %870 = vmatprep.mubr.msk.f32.mxu0 %vm45_vm1, %v37_v2  ;;  %v33_v9 = vld [vmem:[%s1238_s2 + $0x18] sm:$0xff] }
   0x6   :  { %v1098_v7 = vpack.c.bf16 %v31_v5, %v30_v4 }
   0x7   :  { %15 = vsyncpa [#allocation4], 0  ;;  %871 = vmatmul.mubr.msk.f32.vlgmr.msra.gmra.mrb[0].mxu0 %vm45_vm1, %v38_v6  ;;  %vm1033_vm2 = vmmov 0   ;;  %v1109_v10 = vpack.c.bf16 %v33_v9, %v32_v8  ;;  %881 = vmatprep.subr.bf16.mxu0 %v1032_v3  ;;  %v1034_v11 = vmov 0   ;;  %v1035_v12 = vmov 1983009808  }
   0x8   :  { %877 = vmatprep.mubr.msk.bf16.mxu1 %vm1033_vm2, %v1032_v3  ;;  %874 = vmatpush3.bf16.msra.mxu1 %v1098_v7  ;;  %v135_v13 = vunpack.c.l.s4 %v1035_v12  ;;  %v137_v14 = vlaneseq  ;;  %v820_v17 = vld [vmem:[%s1239_s3] ss:$0 sm:$0xff]  ;;  %s1036_s15 = smov 32   ;;  %s1037_s3 = smov 64   ;;  %vm175_vm3 = vcmask 261120   ;;  %vm759_vm4 = vcmask 254976  }
   0x9   :  { %875 = vmatprep.subr.bf16.mxu1 %v1032_v3  ;;  %882 = vmatpush3.bf16.msra.mxu0 %v1098_v7 }
   0xa   :  { %883 = vmatprep.subr.bf16.mxu0 %v1032_v3  ;;  %885 = vmatprep.mubr.msk.bf16.mxu0 %vm1033_vm2, %v1032_v3  ;;  %v136_v15 = vunpack.c.0.s8 %v135_v13  ;;  %v138_v16 = vshrl.u32 %v137_v14, 7 }
   0xc   :  { %876 = vmatpush3.bf16.msra.mxu1 %v1109_v10  ;;  %v1132_v21 = vsub.s32 %v136_v15, %v138_v16 }
   0xd   :  { %884 = vmatpush3.bf16.msra.mxu0 %v1109_v10  ;;  %889 = vmatprep.subr.bf16.mxu1 %v1032_v3 }
   0xe   :  { %897 = vmatprep.subr.bf16.mxu0 %v1032_v3 }
   0xf   :  { %878 = vmatmul.mubr.bf16.vlgmr.msra.gmra.mrb[0].mxu1 %v1034_v11 }
  0x10   :  { %890 = vmatpush3.bf16.msra.mxu1 %v1098_v7  ;;  %893 = vmatprep.mubr.msk.bf16.mxu1 %vm1033_vm2, %v1032_v3 }
  0x11   :  { %891 = vmatprep.subr.bf16.mxu1 %v1032_v3 }
  0x14   :  { %892 = vmatpush3.bf16.msra.mxu1 %v1109_v10 }
  0x15   :  { %905 = vmatprep.subr.bf16.mxu1 %v1032_v3 }
  0xda   :  { %v872_v18 = vpop.f32.mrb[0].mxu0 }
  0xdb   :  { %v1130_v19 = vadd.f32 %v872_v18, %v820_v17  ;;  %v122_v20 = vpop.f32.mrb[1].mxu0 }
  0xdc   :  { %v1134_v22 = vadd.f32 %v820_v17, %v122_v20 }
  0xde   :  { %v140_v23 = vrot.slane %v1134_v22, %v1132_v21  ;;  %v133_v1 = vcombine.high %v1134_v22, %v1134_v22 }
  0xe0   :  { %v148_v44 = vcombine.high %v140_v23, %v140_v23  ;;  %v147_v2 = vrot.slane %v133_v1, %v1132_v21 }
  0xe2   :  { %v213_v24 = vpop.f32.mrb[0].mxu1 }
  0xe3   :  { %v219_v25 = vadd.f32 %v213_v24, %v140_v23  ;;  %v879_v26 = vpop.f32.mrb[1].mxu1 }
  0xe4   :  { %v216_v27 = vpop.f32.mrb[2].mxu1 }
  0xe5   :  { %944 = vtanh.f32 %v219_v25  ;;  %v880_v28 = vpop.f32.mrb[3].mxu1  ;;  %v824_v30 = vmul.f32 -1.442695, %v219_v25 }
  0xe6   :  { %v149_v28 = vcombine.high %v147_v2, %v147_v2 }
  0xe7   :  { %946 = vpow2.f32 %v824_v30 }
  0xef   :  { %v945_v29 = vpop.eup %944 }
  0xf0   :  { %229 = vrot.lane.b32.xlu0 %v945_v29, %s1036_s15 }
  0xf1   :  { %v947_v31 = vpop.eup %946 }
  0xf2   :  { %v223_v32 = vadd.f32 1.0, %v947_v31 }
  0xf4   :  { %948 = vrcp.f32 %v223_v32 }
  0xfe   :  { %v949_v33 = vpop.eup %948 }
  0xff   :  { %v227_v36 = vmul.f32 0.0, %v949_v33 }
 0x162   :  { %v230_v34 = vpop.permute.xlu0 %229 }
 0x163   :  { %v232_v35 = vmul.f32 %v949_v33, %v230_v34 }
 0x165   :  { %234 = vrot.lane.b32.xlu0 %v232_v35, %s1036_s15 }
 0x1d7   :  { %v235_v37 = vpop.permute.xlu0 %234 }
 0x1d8   :  { %v237_v38 = vadd.f32 %v235_v37, %v227_v36 }
 0x1da   :  { %950 = vtanh.f32 %v237_v38 }
 0x1e4   :  { %v951_v39 = vpop.eup %950 }
 0x1e5   :  { %240 = vrot.lane.b32.xlu1 %v951_v39, %s1036_s15 }
 0x257   :  { %v241_v40 = vpop.permute.xlu1 %240 }
 0x258   :  { %v243_v41 = vmul.f32 %v949_v33, %v241_v40 }
 0x25a   :  { %v244_v42 = vpack.c.bf16 %v243_v41, %v243_v41 }
 0x25c   :  { %246 = vrot.lane.b32.xlu1 %v244_v42, %s1037_s3 }
 0x2ce   :  { %v247_v43 = vpop.permute.xlu1 %246 }
 0x2cf   :  { %886 = vmatmul.mubr.msk.bf16.vlgmr.msra.gmra.mrb[4].mxu0 %vm175_vm3, %v247_v43 }
 0x2d0   :  { %898 = vmatpush3.bf16.msra.mxu0 %v1098_v7  ;;  %901 = vmatprep.mubr.msk.bf16.mxu0 %vm1033_vm2, %v1032_v3 }
 0x2d1   :  { %899 = vmatprep.subr.bf16.mxu0 %v1032_v3 }
 0x2d4   :  { %900 = vmatpush3.bf16.msra.mxu0 %v1109_v10 }
 0x2d5   :  { %913 = vmatprep.subr.bf16.mxu0 %v1032_v3 }
 0x3a2   :  { %v285_v45 = vpop.f32.mrb[4].mxu0 }
 0x3a3   :  { %v291_v46 = vadd.f32 %v285_v45, %v148_v44  ;;  %v887_v47 = vpop.f32.mrb[5].mxu0 }
 0x3a4   :  { %v288_v48 = vpop.f32.mrb[6].mxu0 }
 0x3a5   :  { %952 = vtanh.f32 %v291_v46  ;;  %v888_v49 = vpop.f32.mrb[7].mxu0  ;;  %v826_v51 = vmul.f32 -1.442695, %v291_v46 }
 0x3a6   :  { %v157_v49 = vrot.slane %v1130_v19, %v1132_v21 }
 0x3a7   :  { %954 = vpow2.f32 %v826_v51 }
 0x3af   :  { %v953_v50 = vpop.eup %952 }
 0x3b0   :  { %301 = vrot.lane.b32.xlu0 %v953_v50, %s1036_s15 }
 0x3b1   :  { %v955_v52 = vpop.eup %954 }
 0x3b2   :  { %v295_v53 = vadd.f32 1.0, %v955_v52 }
 0x3b4   :  { %956 = vrcp.f32 %v295_v53 }
 0x3be   :  { %v957_v54 = vpop.eup %956 }
 0x3bf   :  { %v299_v57 = vmul.f32 %v957_v54, %v237_v38 }
 0x422   :  { %v302_v55 = vpop.permute.xlu0 %301 }
 0x423   :  { %v304_v56 = vmul.f32 %v957_v54, %v302_v55 }
 0x425   :  { %306 = vrot.lane.b32.xlu1 %v304_v56, %s1036_s15 }
 0x497   :  { %v307_v58 = vpop.permute.xlu1 %306 }
 0x498   :  { %v309_v59 = vadd.f32 %v307_v58, %v299_v57 }
 0x49a   :  { %958 = vtanh.f32 %v309_v59 }
 0x4a4   :  { %v959_v60 = vpop.eup %958 }
 0x4a5   :  { %312 = vrot.lane.b32.xlu0 %v959_v60, %s1036_s15 }
 0x517   :  { %v313_v61 = vpop.permute.xlu0 %312 }
 0x518   :  { %v315_v62 = vmul.f32 %v957_v54, %v313_v61 }
 0x51a   :  { %v316_v63 = vpack.c.bf16 %v315_v62, %v315_v62 }
 0x51c   :  { %318 = vrot.lane.b32.xlu1 %v316_v63, %s1037_s3 }
 0x58e   :  { %v319_v0 = vpop.permute.xlu1 %318 }
 0x58f   :  { %894 = vmatmul.mubr.msk.bf16.vlgmr.msra.gmra.mrb[4].mxu1 %vm175_vm3, %v319_v0 }
 0x590   :  { %906 = vmatpush3.bf16.msra.mxu1 %v1098_v7  ;;  %909 = vmatprep.mubr.msk.bf16.mxu1 %vm1033_vm2, %v1032_v3 }
 0x591   :  { %907 = vmatprep.subr.bf16.mxu1 %v1032_v3 }
 0x594   :  { %908 = vmatpush3.bf16.msra.mxu1 %v1109_v10 }
 0x595   :  { %921 = vmatprep.subr.bf16.mxu1 %v1032_v3 }
 0x662   :  { %v357_v4 = vpop.f32.mrb[4].mxu1 }
 0x663   :  { %v363_v5 = vadd.f32 %v357_v4, %v147_v2  ;;  %v895_v6 = vpop.f32.mrb[5].mxu1 }
 0x664   :  { %v360_v8 = vpop.f32.mrb[6].mxu1 }
 0x665   :  { %960 = vtanh.f32 %v363_v5  ;;  %v896_v9 = vpop.f32.mrb[7].mxu1  ;;  %v828_v12 = vmul.f32 -1.442695, %v363_v5  ;;  %v165_v8 = vcombine.high %v157_v49, %v157_v49 }
 0x667   :  { %962 = vpow2.f32 %v828_v12 }
 0x66f   :  { %v961_v11 = vpop.eup %960 }
 0x670   :  { %373 = vrot.lane.b32.xlu0 %v961_v11, %s1036_s15 }
 0x671   :  { %v963_v13 = vpop.eup %962 }
 0x672   :  { %v367_v14 = vadd.f32 1.0, %v963_v13 }
 0x674   :  { %964 = vrcp.f32 %v367_v14 }
 0x67e   :  { %v965_v15 = vpop.eup %964 }
 0x67f   :  { %v371_v18 = vmul.f32 %v965_v15, %v309_v59 }
 0x6e2   :  { %v374_v16 = vpop.permute.xlu0 %373 }
 0x6e3   :  { %v376_v17 = vmul.f32 %v965_v15, %v374_v16 }
 0x6e5   :  { %378 = vrot.lane.b32.xlu1 %v376_v17, %s1036_s15 }
 0x757   :  { %v379_v20 = vpop.permute.xlu1 %378 }
 0x758   :  { %v381_v22 = vadd.f32 %v379_v20, %v371_v18 }
 0x75a   :  { %966 = vtanh.f32 %v381_v22 }
 0x764   :  { %v967_v23 = vpop.eup %966 }
 0x765   :  { %384 = vrot.lane.b32.xlu0 %v967_v23, %s1036_s15 }
 0x7d7   :  { %v385_v24 = vpop.permute.xlu0 %384 }
 0x7d8   :  { %v387_v25 = vmul.f32 %v965_v15, %v385_v24 }
 0x7da   :  { %v388_v26 = vpack.c.bf16 %v387_v25, %v387_v25 }
 0x7dc   :  { %390 = vrot.lane.b32.xlu1 %v388_v26, %s1037_s3 }
 0x84e   :  { %v391_v27 = vpop.permute.xlu1 %390 }
 0x84f   :  { %902 = vmatmul.mubr.msk.bf16.vlgmr.msra.gmra.mrb[8].mxu0 %vm175_vm3, %v391_v27 }
 0x850   :  { %914 = vmatpush3.bf16.msra.mxu0 %v1098_v7  ;;  %917 = vmatprep.mubr.msk.bf16.mxu0 %vm1033_vm2, %v1032_v3 }
 0x851   :  { %915 = vmatprep.subr.bf16.mxu0 %v1032_v3 }
 0x854   :  { %916 = vmatpush3.bf16.msra.mxu0 %v1109_v10 }
 0x855   :  { %929 = vmatprep.subr.bf16.mxu0 %v1032_v3 }
 0x922   :  { %v429_v29 = vpop.f32.mrb[8].mxu0 }
 0x923   :  { %v435_v30 = vadd.f32 %v429_v29, %v149_v28  ;;  %v903_v31 = vpop.f32.mrb[9].mxu0  ;;  %v150_v29 = vcombine.high %v1130_v19, %v1130_v19 }
 0x924   :  { %v432_v32 = vpop.f32.mrb[10].mxu0 }
 0x925   :  { %968 = vtanh.f32 %v435_v30  ;;  %v904_v33 = vpop.f32.mrb[11].mxu0  ;;  %v830_v35 = vmul.f32 -1.442695, %v435_v30  ;;  %v164_v30 = vrot.slane %v150_v29, %v1132_v21 }
 0x927   :  { %970 = vpow2.f32 %v830_v35 }
 0x92f   :  { %v969_v34 = vpop.eup %968 }
 0x930   :  { %445 = vrot.lane.b32.xlu0 %v969_v34, %s1036_s15 }
 0x931   :  { %v971_v36 = vpop.eup %970 }
 0x932   :  { %v439_v37 = vadd.f32 1.0, %v971_v36 }
 0x934   :  { %972 = vrcp.f32 %v439_v37 }
 0x93e   :  { %v973_v38 = vpop.eup %972 }
 0x93f   :  { %v443_v41 = vmul.f32 %v973_v38, %v381_v22 }
 0x9a2   :  { %v446_v39 = vpop.permute.xlu0 %445 }
 0x9a3   :  { %v448_v40 = vmul.f32 %v973_v38, %v446_v39 }
 0x9a5   :  { %450 = vrot.lane.b32.xlu1 %v448_v40, %s1036_s15 }
 0xa17   :  { %v451_v42 = vpop.permute.xlu1 %450 }
 0xa18   :  { %v453_v43 = vadd.f32 %v451_v42, %v443_v41 }
 0xa1a   :  { %974 = vtanh.f32 %v453_v43 }
 0xa24   :  { %v975_v44 = vpop.eup %974 }
 0xa25   :  { %456 = vrot.lane.b32.xlu0 %v975_v44, %s1036_s15 }
 0xa97   :  { %v457_v45 = vpop.permute.xlu0 %456 }
 0xa98   :  { %v459_v46 = vmul.f32 %v973_v38, %v457_v45 }
 0xa9a   :  { %v460_v47 = vpack.c.bf16 %v459_v46, %v459_v46 }
 0xa9c   :  { %462 = vrot.lane.b32.xlu1 %v460_v47, %s1037_s3 }
 0xb0e   :  { %v463_v48 = vpop.permute.xlu1 %462 }
 0xb0f   :  { %910 = vmatmul.mubr.msk.bf16.vlgmr.msra.gmra.mrb[8].mxu1 %vm175_vm3, %v463_v48 }
 0xb10   :  { %922 = vmatpush3.bf16.msra.mxu1 %v1098_v7  ;;  %925 = vmatprep.mubr.msk.bf16.mxu1 %vm1033_vm2, %v1032_v3 }
 0xb11   :  { %923 = vmatprep.subr.bf16.mxu1 %v1032_v3 }
 0xb14   :  { %924 = vmatpush3.bf16.msra.mxu1 %v1109_v10 }
 0xbe2   :  { %v501_v50 = vpop.f32.mrb[8].mxu1 }
 0xbe3   :  { %v507_v51 = vadd.f32 %v501_v50, %v157_v49  ;;  %v911_v52 = vpop.f32.mrb[9].mxu1  ;;  %v166_v50 = vcombine.high %v164_v30, %v164_v30 }
 0xbe4   :  { %v504_v53 = vpop.f32.mrb[10].mxu1 }
 0xbe5   :  { %976 = vtanh.f32 %v507_v51  ;;  %v912_v54 = vpop.f32.mrb[11].mxu1  ;;  %v832_v56 = vmul.f32 -1.442695, %v507_v51 }
 0xbe7   :  { %978 = vpow2.f32 %v832_v56 }
 0xbef   :  { %v977_v55 = vpop.eup %976 }
 0xbf0   :  { %517 = vrot.lane.b32.xlu0 %v977_v55, %s1036_s15 }
 0xbf1   :  { %v979_v57 = vpop.eup %978 }
 0xbf2   :  { %v511_v58 = vadd.f32 1.0, %v979_v57 }
 0xbf4   :  { %980 = vrcp.f32 %v511_v58 }
 0xbfe   :  { %v981_v59 = vpop.eup %980 }
 0xbff   :  { %v515_v62 = vmul.f32 %v981_v59, %v453_v43 }
 0xc62   :  { %v518_v60 = vpop.permute.xlu0 %517 }
 0xc63   :  { %v520_v61 = vmul.f32 %v981_v59, %v518_v60 }
 0xc65   :  { %522 = vrot.lane.b32.xlu1 %v520_v61, %s1036_s15 }
 0xcd7   :  { %v523_v63 = vpop.permute.xlu1 %522 }
 0xcd8   :  { %v525_v0 = vadd.f32 %v523_v63, %v515_v62  ;;  %v839_v63 = vld [vmem:[%s1240_s4] ss:$0 sm:$0xff]  ;;  %s1038_s4 = smov [#allocation3]  }
 0xcd9   :  { %s810_s18 = sshll.u32 %s1038_s4, 4  ;;  %s811_s18 = int_to_ptr.vmem [resolvable:$true] %s810_s18 }
 0xcda   :  { %982 = vtanh.f32 %v525_v0  ;;  %s1008_s19 = scalar_lea.vmem %s811_s18, 32  ;;  %p1013_p1 = scmp.lt.s32.totalorder %s811_s18, %s811_s18 }
 0xcdb   :  { %p1009_p0 = scmp.ne.s32.totalorder %s811_s18, %s1008_s19  ;;  %p1014_p2 = scmp.lt.s32.totalorder %s1008_s19, %s1008_s19 }
 0xcdd   :  { %p1015_p3 = por %p1014_p2, %p1013_p1 }
 0xcdf   :  { %p1016_p4 = pnand %p1015_p3, %p1009_p0 }
 0xce4   :  { %v983_v1 = vpop.eup %982 }
 0xce5   :  { %528 = vrot.lane.b32.xlu0 %v983_v1, %s1036_s15 }
 0xd57   :  { %v529_v2 = vpop.permute.xlu0 %528 }
 0xd58   :  { %v531_v4 = vmul.f32 %v981_v59, %v529_v2 }
 0xd5a   :  { %v532_v5 = vpack.c.bf16 %v531_v4, %v531_v4 }
 0xd5c   :  { %534 = vrot.lane.b32.xlu1 %v532_v5, %s1037_s3 }
 0xdce   :  { %v535_v6 = vpop.permute.xlu1 %534 }
 0xdcf   :  { %918 = vmatmul.mubr.msk.bf16.vlgmr.msra.gmra.mrb[12].mxu0 %vm175_vm3, %v535_v6 }
 0xdd0   :  { %930 = vmatpush3.bf16.msra.mxu0 %v1098_v7  ;;  %933 = vmatprep.mubr.msk.bf16.mxu0 %vm1033_vm2, %v1032_v3 }
 0xdd1   :  { %931 = vmatprep.subr.bf16.mxu0 %v1032_v3 }
 0xdd4   :  { %932 = vmatpush3.bf16.msra.mxu0 %v1109_v10 }
 0xea2   :  { %v573_v9 = vpop.f32.mrb[12].mxu0 }
 0xea3   :  { %v579_v11 = vadd.f32 %v573_v9, %v165_v8  ;;  %v919_v12 = vpop.f32.mrb[13].mxu0 }
 0xea4   :  { %v576_v13 = vpop.f32.mrb[14].mxu0 }
 0xea5   :  { %984 = vtanh.f32 %v579_v11  ;;  %v920_v14 = vpop.f32.mrb[15].mxu0  ;;  %v834_v16 = vmul.f32 -1.442695, %v579_v11 }
 0xea7   :  { %986 = vpow2.f32 %v834_v16 }
 0xeaf   :  { %v985_v15 = vpop.eup %984 }
 0xeb0   :  { %589 = vrot.lane.b32.xlu0 %v985_v15, %s1036_s15 }
 0xeb1   :  { %v987_v7 = vpop.eup %986 }
 0xeb2   :  { %v583_v17 = vadd.f32 1.0, %v987_v7 }
 0xeb4   :  { %988 = vrcp.f32 %v583_v17 }
 0xebe   :  { %v989_v18 = vpop.eup %988 }
 0xebf   :  { %v587_v10 = vmul.f32 %v989_v18, %v525_v0  ;;  %v773_v0 = vrot.slane %v839_v63, %v1132_v21 }
 0xf22   :  { %v590_v20 = vpop.permute.xlu0 %589 }
 0xf23   :  { %v592_v3 = vmul.f32 %v989_v18, %v590_v20 }
 0xf25   :  { %594 = vrot.lane.b32.xlu1 %v592_v3, %s1036_s15 }
 0xf97   :  { %v595_v22 = vpop.permute.xlu1 %594 }
 0xf98   :  { %v597_v23 = vadd.f32 %v595_v22, %v587_v10 }
 0xf9a   :  { %990 = vtanh.f32 %v597_v23 }
 0xfa4   :  { %v991_v24 = vpop.eup %990 }
 0xfa5   :  { %600 = vrot.lane.b32.xlu0 %v991_v24, %s1036_s15 }
0x1017   :  { %v601_v25 = vpop.permute.xlu0 %600 }
0x1018   :  { %v603_v26 = vmul.f32 %v989_v18, %v601_v25 }
0x101a   :  { %v604_v27 = vpack.c.bf16 %v603_v26, %v603_v26 }
0x101c   :  { %606 = vrot.lane.b32.xlu1 %v604_v27, %s1037_s3 }
0x108e   :  { %v607_v28 = vpop.permute.xlu1 %606 }
0x108f   :  { %926 = vmatmul.mubr.msk.bf16.vlgmr.msra.gmra.mrb[12].mxu1 %vm175_vm3, %v607_v28 }
0x1162   :  { %v645_v31 = vpop.f32.mrb[12].mxu1 }
0x1163   :  { %v651_v32 = vadd.f32 %v645_v31, %v164_v30  ;;  %v927_v33 = vpop.f32.mrb[13].mxu1 }
0x1164   :  { %v648_v34 = vpop.f32.mrb[14].mxu1 }
0x1165   :  { %992 = vtanh.f32 %v651_v32  ;;  %v928_v35 = vpop.f32.mrb[15].mxu1  ;;  %v836_v37 = vmul.f32 -1.442695, %v651_v32 }
0x1167   :  { %994 = vpow2.f32 %v836_v37 }
0x116f   :  { %v993_v36 = vpop.eup %992 }
0x1170   :  { %661 = vrot.lane.b32.xlu0 %v993_v36, %s1036_s15 }
0x1171   :  { %v995_v38 = vpop.eup %994 }
0x1172   :  { %v655_v39 = vadd.f32 1.0, %v995_v38 }
0x1174   :  { %996 = vrcp.f32 %v655_v39 }
0x117e   :  { %v997_v40 = vpop.eup %996 }
0x117f   :  { %v659_v19 = vmul.f32 %v997_v40, %v597_v23 }
0x11e2   :  { %v662_v41 = vpop.permute.xlu0 %661 }
0x11e3   :  { %v664_v42 = vmul.f32 %v997_v40, %v662_v41 }
0x11e5   :  { %666 = vrot.lane.b32.xlu1 %v664_v42, %s1036_s15 }
0x1257   :  { %v667_v43 = vpop.permute.xlu1 %666 }
0x1258   :  { %v669_v44 = vadd.f32 %v667_v43, %v659_v19 }
0x125a   :  { %998 = vtanh.f32 %v669_v44 }
0x1264   :  { %v999_v45 = vpop.eup %998 }
0x1265   :  { %672 = vrot.lane.b32.xlu0 %v999_v45, %s1036_s15 }
0x12d7   :  { %v673_v46 = vpop.permute.xlu0 %672 }
0x12d8   :  { %v675_v47 = vmul.f32 %v997_v40, %v673_v46 }
0x12da   :  { %v676_v48 = vpack.c.bf16 %v675_v47, %v675_v47 }
0x12dc   :  { %678 = vrot.lane.b32.xlu1 %v676_v48, %s1037_s3 }
0x134e   :  { %v679_v49 = vpop.permute.xlu1 %678 }
0x134f   :  { %934 = vmatmul.mubr.msk.bf16.vlgmr.msra.gmra.mrb[16].mxu0 %vm175_vm3, %v679_v49 }
0x1422   :  { %v717_v51 = vpop.f32.mrb[16].mxu0 }
0x1423   :  { %v723_v52 = vadd.f32 %v717_v51, %v166_v50  ;;  %v935_v53 = vpop.f32.mrb[17].mxu0 }
0x1424   :  { %v720_v54 = vpop.f32.mrb[18].mxu0 }
0x1425   :  { %1000 = vtanh.f32 %v723_v52  ;;  %v936_v55 = vpop.f32.mrb[19].mxu0  ;;  %v838_v57 = vmul.f32 -1.442695, %v723_v52 }
0x1427   :  { %1002 = vpow2.f32 %v838_v57 }
0x142f   :  { %v1001_v56 = vpop.eup %1000 }
0x1430   :  { %733 = vrot.lane.b32.xlu0 %v1001_v56, %s1036_s15 }
0x1431   :  { %v1003_v58 = vpop.eup %1002 }
0x1432   :  { %v727_v59 = vadd.f32 1.0, %v1003_v58 }
0x1434   :  { %1004 = vrcp.f32 %v727_v59 }
0x143e   :  { %v1005_v60 = vpop.eup %1004 }
0x143f   :  { %v731_v1 = vmul.f32 %v1005_v60, %v669_v44 }
0x14a2   :  { %v734_v61 = vpop.permute.xlu0 %733 }
0x14a3   :  { %v736_v62 = vmul.f32 %v1005_v60, %v734_v61 }
0x14a5   :  { %738 = vrot.lane.b32.xlu1 %v736_v62, %s1036_s15 }
0x14a9   :  { %774 = vrot.lane.b32.xlu1 %v773_v0, %s1037_s3 }
0x1517   :  { %v739_v2 = vpop.permute.xlu1 %738 }
0x1518   :  { %v741_v4 = vadd.f32 %v739_v2, %v731_v1 }
0x151a   :  { %1006 = vtanh.f32 %v741_v4 }
0x151b   :  { %v775_v8 = vpop.permute.xlu1 %774 }
0x1524   :  { %v1007_v5 = vpop.eup %1006 }
0x1525   :  { %744 = vrot.lane.b32.xlu0 %v1007_v5, %s1036_s15 }
0x1597   :  { %v745_v6 = vpop.permute.xlu0 %744 }
0x1598   :  { %v747_v9 = vmul.f32 %v1005_v60, %v745_v6 }
0x159a   :  { %v777_v11 = vmul.f32 %v775_v8, %v747_v9  ;;  %v755_v13 = vrot.slane %v747_v9, %v1132_v21 }
0x159c   :  { %v785_v12 = vrot.slane %v777_v11, %v1132_v21 }
0x159e   :  { %786 = vrot.lane.b32.xlu0 %v785_v12, %s1037_s3 }
0x15a2   :  { %756 = vrot.lane.b32.xlu0 %v755_v13, %s1037_s3 }
0x1610   :  { %v787_v14 = vpop.permute.xlu0 %786 }
0x1611   :  { %v789_v15 = vsel %vm759_vm4, %v787_v14, 0.0 }
0x1612   :  { %790 = vadd.xlane.f32.xlu1 %v789_v15 }
0x1614   :  { %v757_v16 = vpop.permute.xlu0 %756 }
0x1615   :  { %760 = vst.msk [vmem:[#allocation3] sm:$0x3] %vm759_vm4, %v757_v16 }
0x1616   :  { %1019 = shalt.err (!%p1016_p4)
}
0x1617   :  { %s1020_s22 = scalar_lea.hbm %s1243_s7, 32 }
0x1618   :  { %p1021_p5 = scmp.ne.s32.totalorder %s1243_s7, %s1020_s22  ;;  %p1024_p6 = scmp.lt.u32.totalorder %s1020_s22, %s1243_s7 }
0x161a   :  { %p1026_p7 = pnand %p1024_p6, %p1021_p5 }
0x161c   :  { %1029 = shalt.err (!%p1026_p7)
}
0x161d   :  { %813 = dma.vmem_to_hbm [thread:$0]  %s811_s18, 32, %s1243_s7, [#allocation4]   ;;  %v840_v21 = vld [vmem:[#allocation2] ss:$0 sm:$0xff]  ;;  %vm800_vm5 = vcmask 1024  }
0x169f   :  { %v791_v7 = vpop.xlane.xlu1 %790 }
0x16a0   :  { %v799_v17 = vadd.f32 %v840_v21, %v791_v7 }
0x16a2   :  { %801 = vst.msk [vmem:[%s1242_s6] sm:$0x3] %vm800_vm5, %v799_v17 }
0x16a3   :  { %1030 = dma.done.wait [#allocation4], 32  }
0x16a4   :  { %1031 = vsyncadd [#allocation4], 4294967264 }
0x16a5   :  { %819 = vsyncpa [#allocation4], 1 }

</bundles_post_ra>
